<compile_context>
chip_gen: v6e
topology: v6e:2x2x1
jax: 0.10.0
libtpu: 0.0.40
codegen_flags: <defaults>
</compile_context>

<pallas_src>
import functools

import jax
import jax.numpy as jnp
from jax.experimental import pallas as pl
from jax.experimental.pallas import tpu as pltpu

_SUB = 8  # f32 sublane granularity


def qnet_kernel(x_ref, w1_ref, b1_ref, w2_ref, b2_ref, o_ref):
    """Fused o = relu(x @ w1 + b1) @ w2 + b2, all f32 (f32 accumulation)."""
    h = jnp.dot(x_ref[...], w1_ref[...], preferred_element_type=jnp.float32)
    h = jnp.maximum(h + b1_ref[...], 0.0)                # bias + ReLU on the VPU
    out = jnp.dot(h, w2_ref[...], preferred_element_type=jnp.float32)
    o_ref[...] = (out + b2_ref[...]).astype(o_ref.dtype)


def _round_up(x, m):
    return ((x + m - 1) // m) * m


def _pick_batch_tile(batch, block_batch):
    """Batch tile: <= block_batch rows, 8-row aligned, last block not mostly pad.

    For batches big enough that splitting matters, force >= 2 grid steps so the
    "parallel" batch axis can be sharded across v7x's two TensorCores.
    """
    n_steps = max(1, -(-batch // block_batch))
    if batch >= 512 and n_steps < 2:
        n_steps = 2
    return _round_up(max(1, -(-batch // n_steps)), _SUB)


@functools.partial(jax.jit, static_argnames=("block_batch",))
def linear_qnet_forward(x, w1, b1, w2, b2, *, block_batch=2048):
    """Batch-tiled fused MLP forward.

    x: (B, in) f32, w1: (in, hid), b1: (1, hid), w2: (hid, out), b2: (1, out)
    (weights already in kernel layout -- transpose of PyTorch's (out, in)).
    """
    batch, in_size = x.shape
    hidden = w1.shape[1]
    out_size = w2.shape[1]

    tb = _pick_batch_tile(batch, block_batch)
    batch_p = _round_up(batch, tb)
    if batch_p != batch:                      # pad only the (cheap) batch axis
        x = jnp.pad(x, ((0, batch_p - batch), (0, 0)))

    out_padded = pl.pallas_call(
        qnet_kernel,
        out_shape=jax.ShapeDtypeStruct((batch_p, out_size), jnp.float32),
        grid_spec=pltpu.PrefetchScalarGridSpec(
            num_scalar_prefetch=0,
            grid=(batch_p // tb,),
            in_specs=[
                # x: tiled over batch, UNPADDED in_size lanes (full-dim rule).
                pl.BlockSpec((tb, in_size), lambda i: (i, 0)),
                # weights / biases: constant index_map -> DMA'd once, VMEM-resident.
                pl.BlockSpec((in_size, hidden), lambda i: (0, 0)),
                pl.BlockSpec((1, hidden), lambda i: (0, 0)),
                pl.BlockSpec((hidden, out_size), lambda i: (0, 0)),
                pl.BlockSpec((1, out_size), lambda i: (0, 0)),
            ],
            # UNPADDED out_size lanes: a masked vst on 3 lanes is trivial vs. the
            # ~42x writeback inflation of a 128-lane-padded f32 output.
            out_specs=pl.BlockSpec((tb, out_size), lambda i: (i, 0)),
        ),
        compiler_params=pltpu.CompilerParams(
            # Independent batch blocks -> megacore sharding on v7x (>=2 steps
            # for large batches, see _pick_batch_tile).
            dimension_semantics=("parallel",),
        ),
    )(x, w1, b1, w2, b2)

    # Padded batch rows hold garbage (relu(b1) @ w2 + b2); slice them away.
    # Do NOT reuse out_padded's padded region in any downstream reduction.
    return out_padded[:batch] if batch_p != batch else out_padded


def init_params(key, input_size, hidden_size, output_size):
    """PyTorch nn.Linear-style init U(-1/sqrt(fan_in), 1/sqrt(fan_in)), emitted
    directly in kernel layout ((in, out) weights, (1, n) biases) so the jitted
    forward never pads/casts/transposes params per call."""
    k1, k2, k3, k4 = jax.random.split(key, 4)
    bound1 = 1.0 / jnp.sqrt(jnp.float32(input_size))
    bound2 = 1.0 / jnp.sqrt(jnp.float32(hidden_size))
    w1 = jax.random.uniform(k1, (input_size, hidden_size), jnp.float32, -bound1, bound1)
    b1 = jax.random.uniform(k2, (1, hidden_size), jnp.float32, -bound1, bound1)
    w2 = jax.random.uniform(k3, (hidden_size, output_size), jnp.float32, -bound2, bound2)
    b2 = jax.random.uniform(k4, (1, output_size), jnp.float32, -bound2, bound2)
    return w1, b1, w2, b2


def params_from_torch_layout(w1_oi, b1_o, w2_oi, b2_o):
    """One-time conversion from PyTorch (out, in) weights / (out,) biases to the
    kernel layout.  Call once outside the hot loop."""
    return (w1_oi.T, b1_o.reshape(1, -1), w2_oi.T, b2_o.reshape(1, -1))


# TODO(synk): Linear_QNet.save() (torch checkpoint file I/O) has no kernel equivalent.

if __name__ == "__main__":
    # Shapes implied by the module: state = 11 features, 3 actions.
    input_size, hidden_size, output_size = 11, 32, 3

    key = jax.random.PRNGKey(0)
    kx, kp = jax.random.split(key)
    w1, b1, w2, b2 = init_params(kp, input_size, hidden_size, output_size)

    def ref_fwd(x):
        return jnp.maximum(x @ w1 + b1, 0.0) @ w2 + b2

    # Inference-style tiny batch: single grid step, batch padded 2 -> 8 rows.
    x_small = jax.random.normal(kx, (2, input_size), jnp.float32)
    out_small = jax.block_until_ready(linear_qnet_forward(x_small, w1, b1, w2, b2))
    assert out_small.shape == (2, output_size)
    assert jnp.allclose(out_small, ref_fwd(x_small), atol=1e-2, rtol=1e-2)

    # Replay-minibatch-style batch: multi-step "parallel" grid with a ragged
    # last block (33 rows, tb=8 -> 5 grid steps, 40-row padded batch).
    x_batch = jax.random.normal(kx, (33, input_size), jnp.float32)
    out_batch = jax.block_until_ready(
        linear_qnet_forward(x_batch, w1, b1, w2, b2, block_batch=8))
    assert out_batch.shape == (33, output_size)
    assert jnp.allclose(out_batch, ref_fwd(x_batch), atol=1e-2, rtol=1e-2)

    print("KERNEL_OK")
</pallas_src>

<mosaic_0001>
module attributes {stable_mosaic.version = 11 : i64} {
  func.func @qnet_kernel(%arg0: i32, %arg1: memref<8x11xf32, #tpu.memory_space<vmem>>, %arg2: memref<11x32xf32, #tpu.memory_space<vmem>>, %arg3: memref<1x32xf32, #tpu.memory_space<vmem>>, %arg4: memref<32x3xf32, #tpu.memory_space<vmem>>, %arg5: memref<1x3xf32, #tpu.memory_space<vmem>>, %arg6: memref<8x3xf32, #tpu.memory_space<vmem>>) attributes {dimension_semantics = [#tpu.dimension_semantics<parallel>], iteration_bounds = array<i64: 1>, scalar_prefetch = 0 : i64, scratch_operands = 0 : i64, tpu.core_type = #tpu.core_type<tc>, window_params = [{transform_indices = @transform_0, window_bounds = array<i64: 8, 11>}, {pipeline_mode = #tpu.pipeline_mode<synchronous>, transform_indices = @transform_1, window_bounds = array<i64: 11, 32>}, {pipeline_mode = #tpu.pipeline_mode<synchronous>, transform_indices = @transform_2, window_bounds = array<i64: 1, 32>}, {pipeline_mode = #tpu.pipeline_mode<synchronous>, transform_indices = @transform_3, window_bounds = array<i64: 32, 3>}, {pipeline_mode = #tpu.pipeline_mode<synchronous>, transform_indices = @transform_4, window_bounds = array<i64: 1, 3>}, {transform_indices = @transform_5, window_bounds = array<i64: 8, 3>}]} {
    %c0 = arith.constant 0 : index
    %c0_0 = arith.constant 0 : index
    %0 = vector.load %arg1[%c0, %c0_0] : memref<8x11xf32, #tpu.memory_space<vmem>>, vector<8x11xf32>
    %c0_1 = arith.constant 0 : index
    %c0_2 = arith.constant 0 : index
    %1 = vector.load %arg2[%c0_1, %c0_2] : memref<11x32xf32, #tpu.memory_space<vmem>>, vector<11x32xf32>
    %cst = arith.constant dense<0.000000e+00> : vector<8x32xf32>
    %2 = tpu.matmul %0, %1, %cst {dimension_numbers = #tpu.dot_dimension_numbers<[1], [0], [0], [1], [0, 0, 1, 1], [], []>} : vector<8x11xf32>, vector<11x32xf32>, vector<8x32xf32> -> vector<8x32xf32>
    %c0_3 = arith.constant 0 : index
    %c0_4 = arith.constant 0 : index
    %3 = vector.load %arg3[%c0_3, %c0_4] : memref<1x32xf32, #tpu.memory_space<vmem>>, vector<1x32xf32>
    %4 = vector.broadcast %3 : vector<1x32xf32> to vector<8x32xf32>
    %5 = arith.addf %2, %4 : vector<8x32xf32>
    %cst_5 = arith.constant 0.000000e+00 : f32
    %6 = vector.broadcast %cst_5 : f32 to vector<8x32xf32>
    %7 = arith.maximumf %5, %6 : vector<8x32xf32>
    %c0_6 = arith.constant 0 : index
    %c0_7 = arith.constant 0 : index
    %8 = vector.load %arg4[%c0_6, %c0_7] : memref<32x3xf32, #tpu.memory_space<vmem>>, vector<32x3xf32>
    %cst_8 = arith.constant dense<0.000000e+00> : vector<8x3xf32>
    %9 = tpu.matmul %7, %8, %cst_8 {dimension_numbers = #tpu.dot_dimension_numbers<[1], [0], [0], [1], [0, 0, 1, 1], [], []>} : vector<8x32xf32>, vector<32x3xf32>, vector<8x3xf32> -> vector<8x3xf32>
    %c0_9 = arith.constant 0 : index
    %c0_10 = arith.constant 0 : index
    %10 = vector.load %arg5[%c0_9, %c0_10] : memref<1x3xf32, #tpu.memory_space<vmem>>, vector<1x3xf32>
    %11 = vector.broadcast %10 : vector<1x3xf32> to vector<8x3xf32>
    %12 = arith.addf %9, %11 : vector<8x3xf32>
    %c0_11 = arith.constant 0 : index
    %c0_12 = arith.constant 0 : index
    %13 = vector.load %arg6[%c0_11, %c0_12] : memref<8x3xf32, #tpu.memory_space<vmem>>, vector<8x3xf32>
    tpu.vector_store %arg6[%c0_11, %c0_12], %12 {strides = array<i32>} : memref<8x3xf32, #tpu.memory_space<vmem>>, vector<8x3xf32>,
    return
  }
  func.func @transform_0(%arg0: i32) -> (i32, i32) {
    %c0_i32 = arith.constant 0 : i32
    %c0_i32_0 = arith.constant 0 : i32
    return %arg0, %c0_i32 : i32, i32
  }
  func.func @transform_1(%arg0: i32) -> (i32, i32) {
    %c0_i32 = arith.constant 0 : i32
    %c0_i32_0 = arith.constant 0 : i32
    %c0_i32_1 = arith.constant 0 : i32
    return %c0_i32, %c0_i32_0 : i32, i32
  }
  func.func @transform_2(%arg0: i32) -> (i32, i32) {
    %c0_i32 = arith.constant 0 : i32
    %c0_i32_0 = arith.constant 0 : i32
    %c0_i32_1 = arith.constant 0 : i32
    return %c0_i32, %c0_i32_0 : i32, i32
  }
  func.func @transform_3(%arg0: i32) -> (i32, i32) {
    %c0_i32 = arith.constant 0 : i32
    %c0_i32_0 = arith.constant 0 : i32
    %c0_i32_1 = arith.constant 0 : i32
    return %c0_i32, %c0_i32_0 : i32, i32
  }
  func.func @transform_4(%arg0: i32) -> (i32, i32) {
    %c0_i32 = arith.constant 0 : i32
    %c0_i32_0 = arith.constant 0 : i32
    %c0_i32_1 = arith.constant 0 : i32
    return %c0_i32, %c0_i32_0 : i32, i32
  }
  func.func @transform_5(%arg0: i32) -> (i32, i32) {
    %c0_i32 = arith.constant 0 : i32
    %c0_i32_0 = arith.constant 0 : i32
    return %arg0, %c0_i32 : i32, i32
  }
}

</mosaic_0001>

<bundles_post_ra>
// kernel: linear_qnet_forward.1
= control target key start
LH: loop header
LB: loop body
LE: loop exit
PB: predicated region body
PF: predicated region fallthrough
CT: control target
= control target key end

     0   :  { %vm34_vm0 = vcmask 1042432   ;;  %v233_v0 = vmov 0.0   ;;  %vm234_vm1 = vmmov 0   ;;  %vm30_vm2 = vcmask 89088   ;;  %s295_s1 = inlined_call_operand.vmem [shape: f32[11,32], index: 1, kind: input, shape index: {}]   ;;  %s296_s0 = inlined_call_operand.vmem [shape: f32[8,11], index: 0, kind: input, shape index: {}]   ;;  %s297_s3 = inlined_call_operand.vmem [shape: f32[32,3], index: 3, kind: input, shape index: {}]   ;;  %s298_s2 = inlined_call_operand.vmem [shape: f32[1,32], index: 2, kind: input, shape index: {}]   ;;  %s299_s4 = inlined_call_operand.vmem [shape: f32[1,3], index: 4, kind: input, shape index: {}]   ;;  %s300_s5 = inlined_call_operand.vmem [shape: f32[8,3], index: 5, kind: output, shape index: {}]  }
   0x1   :  { %213 = vmatprep.subr.mxu0 %v233_v0  ;;  %v22_v1 = vld [vmem:[%s295_s1 + $0x8] sm:$0x7]  ;;  %v21_v2 = vld [vmem:[%s295_s1] sm:$0xff]  ;;  %217 = vmatprep.mubr.msk.f32.mxu0 %vm234_vm1, %v233_v0  ;;  %v112_v4 = vld [vmem:[%s297_s3 + $0x18] sm:$0xff]  ;;  %vm120_vm3 = vcmask 261120   ;;  %vm194_vm4 = vcmask 23552  }
   0x2   :  { %214 = vmatpush3.msk.msra.mxu0 %vm34_vm0, %v22_v1  ;;  %v20_v3 = vld [vmem:[%s296_s0] sm:$0xff]  ;;  %220 = vmatprep.subr.mxu1 %v233_v0  ;;  %v111_v5 = vld [vmem:[%s297_s3 + $0x10] sm:$0xff]  ;;  %v110_v6 = vld [vmem:[%s297_s3 + $0x8] sm:$0xff] }
   0x3   :  { %215 = vmatprep.subr.mxu0 %v233_v0  ;;  %221 = vmatpush3.msra.mxu1 %v112_v4  ;;  %v109_v7 = vld [vmem:[%s297_s3] sm:$0xff] }
   0x4   :  { %216 = vmatpush3.msra.mxu0 %v21_v2  ;;  %222 = vmatprep.subr.mxu1 %v233_v0  ;;  %v200_v8 = vld [vmem:[%s298_s2] ss:$0 sm:$0xff] }
   0x5   :  { %218 = vmatmul.mubr.msk.f32.vlgmr.msra.gmra.mxu0 %vm30_vm2, %v20_v3  ;;  %228 = vmatprep.mubr.msk.f32.mxu1 %vm234_vm1, %v233_v0  ;;  %v203_v13 = vld [vmem:[%s299_s4] ss:$0 sm:$0xff] }
   0x6   :  { %223 = vmatpush3.msra.mxu1 %v111_v5 }
   0x7   :  { %224 = vmatprep.subr.mxu1 %v233_v0 }
   0x8   :  { %225 = vmatpush3.msra.mxu1 %v110_v6 }
   0x9   :  { %226 = vmatprep.subr.mxu1 %v233_v0 }
   0xa   :  { %227 = vmatpush3.msra.mxu1 %v109_v7 }
  0xc5   :  { %v104_v9 = vpop.f32.mrf.mxu0 }
  0xc6   :  { %v105_v10 = vadd.f32 %v200_v8, %v104_v9 }
  0xc7   :  { %v219_v11 = vpop.f32.mrf.mxu0 }
  0xc8   :  { %v108_v12 = vmax.f32 %v105_v10, 0.0 }
  0xca   :  { %229 = vmatmul.mubr.msk.f32.vlgmr.msra.gmra.mxu1 %vm120_vm3, %v108_v12 }
 0x18a   :  { %v190_v14 = vpop.f32.mrf.mxu1 }
 0x18b   :  { %v191_v15 = vadd.f32 %v203_v13, %v190_v14 }
 0x18c   :  { %v230_v16 = vpop.f32.mrf.mxu1 }
 0x18d   :  { %195 = vst.msk [vmem:[%s300_s5] sm:$0xff] %vm194_vm4, %v191_v15 }

</bundles_post_ra>
